<compile_context>
chip_gen: v5e
topology: v5e:2x2
jax: 0.10.0
libtpu: 0.0.40
codegen_flags: <defaults>
</compile_context>

<pallas_src>
import jax
import jax.numpy as jnp
from jax.experimental import pallas as pl
from jax.experimental.pallas import tpu as pltpu  # noqa: F401 (see TODO above)


def time_embedding_kernel(x_ref, w1_ref, b_ref, w2_ref, o_ref):
    # linear1 in f32 (K=32; negligible MXU cost, best parity with f32 module).
    h = jnp.dot(x_ref[...], w1_ref[...], preferred_element_type=jnp.float32)
    h = h + b_ref[0:1, :]
    # SiLU in f32 (EUP sigmoid overlaps other slots; v5e has no bf16 VPU/EUP).
    h = h * jax.nn.sigmoid(h)
    # linear2: bf16 operands (dominant weight traffic), f32 accumulation.
    out = jnp.dot(
        h.astype(jnp.bfloat16),
        w2_ref[...],
        preferred_element_type=jnp.float32,
    )
    out = out + b_ref[1:2, :]
    o_ref[...] = out.astype(o_ref.dtype)


def prepare_time_embedding_params(w1, b1, w2, b2):
    """One-time parameter prep — NOT in the per-call path.

    - w1 kept f32 (first matmul stays f32 for parity).
    - w2 persisted as bf16 (halves the dominant DMA bytes every call).
    - b1/b2 stacked into a single (2, hidden) f32 array -> one DMA instead of two.
    """
    n_embd, hidden = w1.shape
    assert w2.shape == (hidden, hidden)
    assert b1.shape == (hidden,) and b2.shape == (hidden,)
    w1_f32 = w1.astype(jnp.float32)
    w2_bf16 = w2.astype(jnp.bfloat16)
    b_stack = jnp.stack(
        [b1.astype(jnp.float32), b2.astype(jnp.float32)], axis=0
    )  # (2, hidden)
    return w1_f32, b_stack, w2_bf16


def time_embedding(x, params):
    w1, b_stack, w2 = params
    B, n_embd = x.shape
    hidden = w1.shape[1]  # 4 * n_embd
    assert w1.shape == (n_embd, hidden)
    assert w2.shape == (hidden, hidden)
    assert b_stack.shape == (2, hidden)

    # Full-array blocks, single grid point (grid=()).
    full = lambda shape: pl.BlockSpec(shape, lambda: (0,) * len(shape))

    itemsize = lambda a: a.size * a.dtype.itemsize
    cost = pl.CostEstimate(
        flops=2 * B * n_embd * hidden + 2 * B * hidden * hidden,
        transcendentals=B * hidden,  # sigmoid
        bytes_accessed=(
            itemsize(x) + itemsize(w1) + itemsize(b_stack) + itemsize(w2)
            + B * hidden * jnp.dtype(x.dtype).itemsize
        ),
    )

    return pl.pallas_call(
        time_embedding_kernel,
        out_shape=jax.ShapeDtypeStruct((B, hidden), x.dtype),
        in_specs=[
            full((B, n_embd)),
            full((n_embd, hidden)),
            full((2, hidden)),
            full((hidden, hidden)),
        ],
        out_specs=full((B, hidden)),
        cost_estimate=cost,
    )(x, w1, b_stack, w2)


def time_embedding_ref(x, w1, b1, w2, b2):
    h = x @ w1 + b1
    h = h * jax.nn.sigmoid(h)
    return h @ w2 + b2


if __name__ == "__main__":
    # Small shapes consistent with the module: batch=2, n_embd=32 -> hidden=128.
    B, n_embd = 2, 32
    hidden = 4 * n_embd

    key = jax.random.PRNGKey(0)
    k_x, k_w1, k_b1, k_w2, k_b2 = jax.random.split(key, 5)

    x = jax.random.normal(k_x, (B, n_embd), dtype=jnp.float32)
    # Deterministic "nn.Linear"-like init (uniform in +-1/sqrt(fan_in)).
    w1 = jax.random.uniform(k_w1, (n_embd, hidden), jnp.float32,
                            -1.0 / n_embd ** 0.5, 1.0 / n_embd ** 0.5)
    b1 = jax.random.uniform(k_b1, (hidden,), jnp.float32,
                            -1.0 / n_embd ** 0.5, 1.0 / n_embd ** 0.5)
    w2 = jax.random.uniform(k_w2, (hidden, hidden), jnp.float32,
                            -1.0 / hidden ** 0.5, 1.0 / hidden ** 0.5)
    b2 = jax.random.uniform(k_b2, (hidden,), jnp.float32,
                            -1.0 / hidden ** 0.5, 1.0 / hidden ** 0.5)

    # Parameter prep happens once, outside the per-call path.
    params = prepare_time_embedding_params(w1, b1, w2, b2)

    out = time_embedding(x, params)
    out = jax.block_until_ready(out)

    ref = time_embedding_ref(x, w1, b1.reshape(1, -1), w2, b2.reshape(1, -1))
    assert out.shape == (B, hidden)
    # Second matmul uses bf16 operands (f32 accumulation): loosened tolerance.
    assert jnp.allclose(out, ref, atol=2e-2, rtol=2e-2)

    print("KERNEL_OK")
</pallas_src>

<mosaic_0001>
module attributes {stable_mosaic.version = 11 : i64} {
  func.func @time_embedding_kernel(%arg0: memref<2x32xf32, #tpu.memory_space<vmem>>, %arg1: memref<32x128xf32, #tpu.memory_space<vmem>>, %arg2: memref<2x128xf32, #tpu.memory_space<vmem>>, %arg3: memref<128x128xbf16, #tpu.memory_space<vmem>>, %arg4: memref<2x128xf32, #tpu.memory_space<vmem>>) attributes {dimension_semantics = [], scalar_prefetch = 0 : i64, scratch_operands = 0 : i64, tpu.core_type = #tpu.core_type<tc>} {
    %c0 = arith.constant 0 : index
    %c0_0 = arith.constant 0 : index
    %0 = vector.load %arg0[%c0, %c0_0] : memref<2x32xf32, #tpu.memory_space<vmem>>, vector<2x32xf32>
    %c0_1 = arith.constant 0 : index
    %c0_2 = arith.constant 0 : index
    %1 = vector.load %arg1[%c0_1, %c0_2] : memref<32x128xf32, #tpu.memory_space<vmem>>, vector<32x128xf32>
    %cst = arith.constant dense<0.000000e+00> : vector<2x128xf32>
    %2 = tpu.matmul %0, %1, %cst {dimension_numbers = #tpu.dot_dimension_numbers<[1], [0], [0], [1], [0, 0, 1, 1], [], []>} : vector<2x32xf32>, vector<32x128xf32>, vector<2x128xf32> -> vector<2x128xf32>
    %c0_3 = arith.constant 0 : index
    %c0_4 = arith.constant 0 : index
    %3 = vector.load %arg2[%c0_3, %c0_4] : memref<2x128xf32, #tpu.memory_space<vmem>>, vector<1x128xf32>
    %4 = vector.broadcast %3 : vector<1x128xf32> to vector<2x128xf32>
    %5 = arith.addf %2, %4 : vector<2x128xf32>
    %6 = arith.negf %5 : vector<2x128xf32>
    %7 = math.exp %6 : vector<2x128xf32>
    %cst_5 = arith.constant 1.000000e+00 : f32
    %8 = vector.broadcast %cst_5 : f32 to vector<2x128xf32>
    %9 = arith.addf %8, %7 : vector<2x128xf32>
    %10 = arith.divf %8, %9 : vector<2x128xf32>
    %11 = arith.mulf %5, %10 : vector<2x128xf32>
    %12 = arith.truncf %11 : vector<2x128xf32> to vector<2x128xbf16>
    %c0_6 = arith.constant 0 : index
    %c0_7 = arith.constant 0 : index
    %13 = vector.load %arg3[%c0_6, %c0_7] : memref<128x128xbf16, #tpu.memory_space<vmem>>, vector<128x128xbf16>
    %cst_8 = arith.constant dense<0.000000e+00> : vector<2x128xf32>
    %14 = tpu.matmul %12, %13, %cst_8 {dimension_numbers = #tpu.dot_dimension_numbers<[1], [0], [0], [1], [0, 0, 1, 1], [], []>} : vector<2x128xbf16>, vector<128x128xbf16>, vector<2x128xf32> -> vector<2x128xf32>
    %c1 = arith.constant 1 : index
    %c0_9 = arith.constant 0 : index
    %15 = vector.load %arg2[%c1, %c0_9] : memref<2x128xf32, #tpu.memory_space<vmem>>, vector<1x128xf32>
    %16 = vector.broadcast %15 : vector<1x128xf32> to vector<2x128xf32>
    %17 = arith.addf %14, %16 : vector<2x128xf32>
    %c0_10 = arith.constant 0 : index
    %c0_11 = arith.constant 0 : index
    %18 = vector.load %arg4[%c0_10, %c0_11] : memref<2x128xf32, #tpu.memory_space<vmem>>, vector<2x128xf32>
    tpu.vector_store %arg4[%c0_10, %c0_11], %17 {strides = array<i32>} : memref<2x128xf32, #tpu.memory_space<vmem>>, vector<2x128xf32>,
    return
  }
}

</mosaic_0001>

<bundles_post_ra>
// kernel: tpu_custom_call.1
= control target key start
LH: loop header
LB: loop body
LE: loop exit
PB: predicated region body
PF: predicated region fallthrough
CT: control target
= control target key end

     0   :  { %9 = vsyncpa [#allocation3], 0  ;;  %s462_s0 = inlined_call_operand.hbm [shape: f32[2,32], index: 0, kind: input, shape index: {}]   ;;  %s463_s1 = inlined_call_operand.hbm [shape: f32[32,128], index: 1, kind: input, shape index: {}]   ;;  %s464_s2 = inlined_call_operand.hbm [shape: f32[2,128], index: 2, kind: input, shape index: {}]   ;;  %s465_s3 = inlined_call_operand.hbm [shape: bf16[128,128], index: 3, kind: input, shape index: {}]   ;;  %s466_s4 = inlined_call_operand.hbm [shape: f32[2,128], index: 4, kind: output, shape index: {}]  }
   0x1   :  { %10 = vsyncpa [#allocation6], 0 }
   0x2   :  { %11 = vsyncpa [#allocation9], 0  ;;  %s28_s17 = sshll.u32 %s463_s1, 4  ;;  %s29_s17 = int_to_ptr.hbm [resolvable:$true] %s28_s17 }
   0x3   :  { %12 = vsyncpa [#allocation4], 0  ;;  %s413_s18 = smov [#allocation5]   ;;  %s18_s22 = sshll.u32 %s462_s0, 4  ;;  %s19_s22 = int_to_ptr.hbm [resolvable:$true] %s18_s22 }
   0x4   :  { %s30_s19 = sshll.u32 %s413_s18, 4  ;;  %s414_s23 = smov 128   ;;  %s31_s19 = int_to_ptr.vmem [resolvable:$true] %s30_s19 }
   0x5   :  { %s415_s24 = smov 8   ;;  %s416_s25 = smov [#allocation2]  }
   0x6   :  { %36 = dma.hbm_to_vmem [thread:$0]  %s29_s17, 512, %s31_s19, [#allocation6], %s414_s23, %s414_s23, %s415_s24  }
   0x7   :  { %s20_s26 = sshll.u32 %s416_s25, 4  ;;  %s42_s29 = sshll.u32 %s464_s2, 4  ;;  %s21_s26 = int_to_ptr.vmem [resolvable:$true] %s20_s26  ;;  %s43_s29 = int_to_ptr.hbm [resolvable:$true] %s42_s29 }
   0x8   :  { %23 = dma.hbm_to_vmem [thread:$0]  %s19_s22, 32, %s21_s26, [#allocation3]  }
   0x9   :  { %s52_s5 = sshll.u32 %s465_s3, 4  ;;  %s417_s6 = smov [#allocation7]   ;;  %s53_s5 = int_to_ptr.hbm [resolvable:$true] %s52_s5 }
   0xa   :  { %s44_s7 = sshll.u32 %s417_s6, 4  ;;  %s418_s0 = smov [#allocation8]   ;;  %s45_s7 = int_to_ptr.vmem [resolvable:$true] %s44_s7 }
   0xb   :  { %47 = dma.hbm_to_vmem [thread:$0]  %s43_s29, 32, %s45_s7, [#allocation6]  }
   0xc   :  { %s54_s8 = sshll.u32 %s418_s0, 4  ;;  %s419_s9 = smov 64   ;;  %s55_s8 = int_to_ptr.vmem [resolvable:$true] %s54_s8 }
   0xd   :  { %s420_s10 = smov 4  }
   0xe   :  { %60 = dma.hbm_to_vmem [thread:$0]  %s53_s5, 1024, %s55_s8, [#allocation9], %s419_s9, %s419_s9, %s420_s10  }
   0xf   :  { %405 = dma.done.wait [#allocation3], 32  }
  0x10   :  { %406 = vsyncadd [#allocation3], 4294967264 }
  0x11   :  { %407 = dma.done.wait [#allocation6], 544  }
  0x12   :  { %408 = vsyncadd [#allocation6], 4294966752 }
  0x13   :  { %409 = dma.done.wait [#allocation9], 1024  }
  0x14   :  { %410 = vsyncadd [#allocation9], 4294966272  ;;  %v81_v0 = vld [vmem:[#allocation5 + $0x18] sm:$0xff]  ;;  %v80_v1 = vld [vmem:[#allocation5 + $0x10] sm:$0xff]  ;;  %vm84_vm0 = vcmask 261120   ;;  %s421_s2 = smov [#allocation10]  }
  0x15   :  { %100 = vmatpush.msra.mxu0 %v81_v0  ;;  %v79_v2 = vld [vmem:[#allocation5 + $0x8] sm:$0xff]  ;;  %v78_v3 = vld [vmem:[#allocation5] sm:$0xff]  ;;  %v77_v4 = vld [vmem:[#allocation2] sm:$0x3]  ;;  %s214_s3 = sshll.u32 %s421_s2, 4  ;;  %s216_s13 = sshll.u32 %s466_s4, 4  ;;  %s215_s3 = int_to_ptr.vmem [resolvable:$true] %s214_s3  ;;  %s217_s13 = int_to_ptr.hbm [resolvable:$true] %s216_s13 }
  0x16   :  { %v269_v5 = vld [vmem:[#allocation8 + $0x38] sm:$0xff]  ;;  %v268_v6 = vld [vmem:[#allocation8 + $0x30] sm:$0xff]  ;;  %v267_v7 = vld [vmem:[#allocation8 + $0x28] sm:$0xff] }
  0x17   :  { %101 = vmatpush.msra.mxu0 %v80_v1  ;;  %195 = vmatpush.bf16.msra.mxu1 %v269_v5  ;;  %v266_v8 = vld [vmem:[#allocation8 + $0x20] sm:$0xff]  ;;  %v265_v9 = vld [vmem:[#allocation8 + $0x18] sm:$0xff]  ;;  %v264_v10 = vld [vmem:[#allocation8 + $0x10] sm:$0xff] }
  0x18   :  { %v263_v11 = vld [vmem:[#allocation8 + $0x8] sm:$0xff]  ;;  %v262_v12 = vld [vmem:[#allocation8] sm:$0xff]  ;;  %v279_v13 = vld [vmem:[#allocation7] ss:$0 sm:$0xff] }
  0x19   :  { %102 = vmatpush.msra.mxu0 %v79_v2  ;;  %v280_v31 = vld [vmem:[#allocation7 + $0x1] ss:$0 sm:$0xff] }
  0x1b   :  { %103 = vmatpush.msra.mxu0 %v78_v3  ;;  %196 = vmatpush.bf16.msra.mxu1 %v268_v6 }
  0x1c   :  { %228 = vmatmul.msk.f32.vlgmr.msra.gmra.mxu0 %vm84_vm0, %v77_v4 }
  0x1f   :  { %197 = vmatpush.bf16.msra.mxu1 %v267_v7 }
  0x23   :  { %198 = vmatpush.bf16.msra.mxu1 %v266_v8 }
  0x27   :  { %199 = vmatpush.bf16.msra.mxu1 %v265_v9 }
  0x2b   :  { %200 = vmatpush.bf16.msra.mxu1 %v264_v10 }
  0x2f   :  { %201 = vmatpush.bf16.msra.mxu1 %v263_v11 }
  0x33   :  { %202 = vmatpush.bf16.msra.mxu1 %v262_v12 }
  0x99   :  { %v105_v14 = vpop.f32.mrf.mxu0 }
  0x9a   :  { %v106_v15 = vadd.f32 %v279_v13, %v105_v14 }
  0x9c   :  { %v229_v16 = vmul.f32 -1.442695, %v106_v15 }
  0x9e   :  { %281 = vpow2.f32 %v229_v16 }
  0xa4   :  { %v282_v17 = vpop.eup %281 }
  0xa5   :  { %v111_v18 = vadd.f32 1.0, %v282_v17 }
  0xa7   :  { %283 = vrcp.f32 %v111_v18  ;;  %v123_v22 = vand.u32 2147483648, %v111_v18  ;;  %v121_v24 = vand.u32 2147483647, %v111_v18  ;;  %vm117_vm2 = vweird.f32 %v111_v18 }
  0xa9   :  { %v124_v26 = vor.u32 1.1754944e-38, %v123_v22  ;;  %vm122_vm4 = vcmp.eq.f32.partialorder %v121_v24, 8.507059e+37 }
  0xad   :  { %v284_v19 = vpop.eup %283 }
  0xae   :  { %v113_v20 = vmul.f32 %v284_v19, %v111_v18  ;;  %vm118_vm1 = vweird.f32 %v284_v19 }
  0xaf   :  { %vm119_vm3 = vmor %vm117_vm2, %vm118_vm1 }
  0xb0   :  { %v114_v21 = vsub.f32 1.0, %v113_v20 }
  0xb2   :  { %v115_v23 = vmul.f32 %v284_v19, %v114_v21 }
  0xb4   :  { %v116_v25 = vadd.f32 %v284_v19, %v115_v23 }
  0xb6   :  { %v120_v27 = vsel %vm119_vm3, %v284_v19, %v116_v25 }
  0xb7   :  { %v125_v28 = vsel %vm122_vm4, %v124_v26, %v120_v27 }
  0xb8   :  { %v127_v29 = vmul.f32 %v125_v28, %v106_v15 }
  0xba   :  { %v128_v30 = vpack.c.bf16 %v127_v29, %v127_v29 }
  0xbc   :  { %203 = vmatmul.bf16.vlgmr.msra.gmra.mxu1 %v128_v30 }
 0x139   :  { %v204_v32 = vpop.f32.mrf.mxu1 }
 0x13a   :  { %v205_v33 = vadd.f32 %v280_v31, %v204_v32 }
 0x13c   :  { %208 = vst [vmem:[#allocation10] sm:$0x3] %v205_v33 }
 0x13d   :  { %219 = dma.vmem_to_hbm [thread:$0]  %s215_s3, 32, %s217_s13, [#allocation4]  }
 0x141   :  { %v206_v34 = vpop.f32.mrf.mxu1 }
 0x142   :  { %411 = dma.done.wait [#allocation4], 32  }
 0x143   :  { %412 = vsyncadd [#allocation4], 4294967264 }
 0x144   :  { %224 = vsyncpa [#allocation3], 1 }
 0x145   :  { %225 = vsyncpa [#allocation6], 1 }
 0x146   :  { %226 = vsyncpa [#allocation9], 1 }
 0x147   :  { %227 = vsyncpa [#allocation4], 1 }

</bundles_post_ra>
